<compile_context>
chip_gen: v6e
topology: v6e:2x2x1
jax: 0.10.0
libtpu: 0.0.40
codegen_flags: <defaults>
</compile_context>

<pallas_src>
import functools

import jax
import jax.numpy as jnp
from jax.experimental import pallas as pl
from jax.experimental.pallas import tpu as pltpu


def _round_up(n, m):
    return ((n + m - 1) // m) * m


# ---------------------------------------------------------------------------
# Kernel
# ---------------------------------------------------------------------------
def dueling_kernel(x_ref, w1_ref, b1_ref, w2_ref, b2_ref, wq_ref, bq_ref, q_ref):
    # Backbone MLP: Linear(obs,512)+ReLU -> Linear(512,128)+ReLU.
    # bf16 operands on the MXU, f32 accumulation; elementwise in f32.
    x = x_ref[...]                                                # (tb, obs) f32
    h1 = jnp.dot(x.astype(jnp.bfloat16), w1_ref[...],
                 preferred_element_type=jnp.float32)
    h1 = jnp.maximum(h1 + b1_ref[...], 0.0)                       # (tb, 512) f32
    h2 = jnp.dot(h1.astype(jnp.bfloat16), w2_ref[...],
                 preferred_element_type=jnp.float32)
    h2 = jnp.maximum(h2 + b2_ref[...], 0.0)                       # (tb, 128) f32

    # Pre-folded dueling head: q = h2 @ Wq + bq
    # (Wq already encodes value + adv - mean(adv); padded to 128 lanes.)
    q = jnp.dot(h2.astype(jnp.bfloat16), wq_ref[...],
                preferred_element_type=jnp.float32) + bq_ref[...]
    q_ref[...] = q.astype(q_ref.dtype)


# ---------------------------------------------------------------------------
# Wrapper
# ---------------------------------------------------------------------------
def prepare_params(p):
    """One-time prep: fold the dueling combine into a single head and cast
    matmul weights to bf16. Biases stay f32."""
    wa, ba = p["wa"], p["ba"]                      # (128, ac), (1, ac)
    wv, bv = p["wv"], p["bv"]                      # (128, 1),  (1, 1)
    ac = wa.shape[1]
    npad = _round_up(ac, 128)                      # lane-dense output width

    wq = wv + wa - jnp.mean(wa, axis=1, keepdims=True)            # (128, ac)
    bq = bv + ba - jnp.mean(ba, axis=1, keepdims=True)            # (1, ac)
    wq = jnp.pad(wq, ((0, 0), (0, npad - ac)))
    bq = jnp.pad(bq, ((0, 0), (0, npad - ac)))

    return dict(
        w1=p["w1"].astype(jnp.bfloat16), b1=p["b1"],
        w2=p["w2"].astype(jnp.bfloat16), b2=p["b2"],
        wq=wq.astype(jnp.bfloat16), bq=bq,
        ac=ac, n_pad=npad,
    )


@functools.partial(jax.jit, static_argnames=("tile_b",))
def _dueling_call(x_padded, w1, b1, w2, b2, wq, bq, *, tile_b):
    bp, obs = x_padded.shape
    npad = wq.shape[1]

    def resident(shape):  # weights/biases: same block every grid step -> no re-DMA
        return pl.BlockSpec(shape, lambda i: (0, 0))

    return pl.pallas_call(
        dueling_kernel,
        out_shape=jax.ShapeDtypeStruct((bp, npad), jnp.float32),
        grid=(bp // tile_b,),
        in_specs=[
            pl.BlockSpec((tile_b, obs), lambda i: (i, 0)),   # x tiled over batch
            resident(w1.shape), resident(b1.shape),
            resident(w2.shape), resident(b2.shape),
            resident(wq.shape), resident(bq.shape),
        ],
        out_specs=pl.BlockSpec((tile_b, npad), lambda i: (i, 0)),
        compiler_params=pltpu.CompilerParams(
            # batch tiles are independent -> megacore sharding on v7x
            dimension_semantics=("parallel",),
        ),
    )(x_padded, w1, b1, w2, b2, wq, bq)


def dueling_forward(x, kp, *, tile_b=256):
    """x: [B, obs] float32. kp: output of prepare_params(). Returns [B, ac] f32."""
    B, _ = x.shape
    ac = kp["ac"]

    # Effective tile: multiple of 8 (sublane), capped at tile_b; pad batch.
    tb = min(tile_b, _round_up(B, 8))
    bp = _round_up(B, tb)
    if bp != B:
        x = jnp.pad(x, ((0, bp - B), (0, 0)))

    q = _dueling_call(x, kp["w1"], kp["b1"], kp["w2"], kp["b2"],
                      kp["wq"], kp["bq"], tile_b=tb)
    return q[:B, :ac]


# ---------------------------------------------------------------------------
# Init + reference (original f32 semantics)
# ---------------------------------------------------------------------------
def init_params(key, obs, ac):
    """torch.nn.Linear-style init (U[-1/sqrt(fan_in), 1/sqrt(fan_in)]).
    Weights stored as [in, out]; biases as [1, out]."""
    def linear(k, fan_in, fan_out):
        kw, kb = jax.random.split(k)
        bound = 1.0 / jnp.sqrt(fan_in)
        w = jax.random.uniform(kw, (fan_in, fan_out), jnp.float32, -bound, bound)
        b = jax.random.uniform(kb, (1, fan_out), jnp.float32, -bound, bound)
        return w, b

    k1, k2, k3, k4 = jax.random.split(key, 4)
    w1, b1 = linear(k1, obs, 512)
    w2, b2 = linear(k2, 512, 128)
    wv, bv = linear(k3, 128, 1)
    wa, ba = linear(k4, 128, ac)
    return dict(w1=w1, b1=b1, w2=w2, b2=b2, wv=wv, bv=bv, wa=wa, ba=ba)


def reference_forward(x, p):
    h1 = jnp.maximum(x @ p["w1"] + p["b1"], 0.0)
    h2 = jnp.maximum(h1 @ p["w2"] + p["b2"], 0.0)
    value = h2 @ p["wv"] + p["bv"]
    adv = h2 @ p["wa"] + p["ba"]
    return value + adv - adv.mean(axis=1, keepdims=True)


if __name__ == "__main__":
    obs, ac = 32, 6
    key = jax.random.PRNGKey(0)
    kparam, kx1, kx2 = jax.random.split(key, 3)

    params = init_params(kparam, obs, ac)
    packed = prepare_params(params)   # one-time head fold + bf16 cast

    # Small batch (single tile) and a batch that exercises multi-tile + padding.
    for batch, kx in ((2, kx1), (600, kx2)):
        x = jax.random.normal(kx, (batch, obs), jnp.float32)
        q = jax.block_until_ready(dueling_forward(x, packed))
        q_ref = reference_forward(x, params)
        assert q.shape == (batch, ac)
        # bf16 matmul operands (f32 accumulate) -> ~1e-3-level differences vs f32 ref.
        assert jnp.allclose(q, q_ref, atol=2e-2, rtol=2e-2), \
            f"mismatch vs JAX reference at batch={batch}"

    print("KERNEL_OK")
</pallas_src>

<mosaic_0001>
module attributes {stable_mosaic.version = 11 : i64} {
  func.func @dueling_kernel(%arg0: i32, %arg1: memref<8x32xf32, #tpu.memory_space<vmem>>, %arg2: memref<32x512xbf16, #tpu.memory_space<vmem>>, %arg3: memref<1x512xf32, #tpu.memory_space<vmem>>, %arg4: memref<512x128xbf16, #tpu.memory_space<vmem>>, %arg5: memref<1x128xf32, #tpu.memory_space<vmem>>, %arg6: memref<128x128xbf16, #tpu.memory_space<vmem>>, %arg7: memref<1x128xf32, #tpu.memory_space<vmem>>, %arg8: memref<8x128xf32, #tpu.memory_space<vmem>>) attributes {dimension_semantics = [#tpu.dimension_semantics<parallel>], iteration_bounds = array<i64: 1>, scalar_prefetch = 0 : i64, scratch_operands = 0 : i64, tpu.core_type = #tpu.core_type<tc>, window_params = [{transform_indices = @transform_0, window_bounds = array<i64: 8, 32>}, {pipeline_mode = #tpu.pipeline_mode<synchronous>, transform_indices = @transform_1, window_bounds = array<i64: 32, 512>}, {pipeline_mode = #tpu.pipeline_mode<synchronous>, transform_indices = @transform_2, window_bounds = array<i64: 1, 512>}, {pipeline_mode = #tpu.pipeline_mode<synchronous>, transform_indices = @transform_3, window_bounds = array<i64: 512, 128>}, {pipeline_mode = #tpu.pipeline_mode<synchronous>, transform_indices = @transform_4, window_bounds = array<i64: 1, 128>}, {pipeline_mode = #tpu.pipeline_mode<synchronous>, transform_indices = @transform_5, window_bounds = array<i64: 128, 128>}, {pipeline_mode = #tpu.pipeline_mode<synchronous>, transform_indices = @transform_6, window_bounds = array<i64: 1, 128>}, {transform_indices = @transform_7, window_bounds = array<i64: 8, 128>}]} {
    %c0 = arith.constant 0 : index
    %c0_0 = arith.constant 0 : index
    %0 = vector.load %arg1[%c0, %c0_0] : memref<8x32xf32, #tpu.memory_space<vmem>>, vector<8x32xf32>
    %1 = arith.truncf %0 : vector<8x32xf32> to vector<8x32xbf16>
    %c0_1 = arith.constant 0 : index
    %c0_2 = arith.constant 0 : index
    %2 = vector.load %arg2[%c0_1, %c0_2] : memref<32x512xbf16, #tpu.memory_space<vmem>>, vector<32x512xbf16>
    %cst = arith.constant dense<0.000000e+00> : vector<8x512xf32>
    %3 = tpu.matmul %1, %2, %cst {dimension_numbers = #tpu.dot_dimension_numbers<[1], [0], [0], [1], [0, 0, 1, 1], [], []>} : vector<8x32xbf16>, vector<32x512xbf16>, vector<8x512xf32> -> vector<8x512xf32>
    %c0_3 = arith.constant 0 : index
    %c0_4 = arith.constant 0 : index
    %4 = vector.load %arg3[%c0_3, %c0_4] : memref<1x512xf32, #tpu.memory_space<vmem>>, vector<1x512xf32>
    %5 = vector.broadcast %4 : vector<1x512xf32> to vector<8x512xf32>
    %6 = arith.addf %3, %5 : vector<8x512xf32>
    %cst_5 = arith.constant 0.000000e+00 : f32
    %7 = vector.broadcast %cst_5 : f32 to vector<8x512xf32>
    %8 = arith.maximumf %6, %7 : vector<8x512xf32>
    %9 = arith.truncf %8 : vector<8x512xf32> to vector<8x512xbf16>
    %c0_6 = arith.constant 0 : index
    %c0_7 = arith.constant 0 : index
    %10 = vector.load %arg4[%c0_6, %c0_7] : memref<512x128xbf16, #tpu.memory_space<vmem>>, vector<512x128xbf16>
    %cst_8 = arith.constant dense<0.000000e+00> : vector<8x128xf32>
    %11 = tpu.matmul %9, %10, %cst_8 {dimension_numbers = #tpu.dot_dimension_numbers<[1], [0], [0], [1], [0, 0, 1, 1], [], []>} : vector<8x512xbf16>, vector<512x128xbf16>, vector<8x128xf32> -> vector<8x128xf32>
    %c0_9 = arith.constant 0 : index
    %c0_10 = arith.constant 0 : index
    %12 = vector.load %arg5[%c0_9, %c0_10] : memref<1x128xf32, #tpu.memory_space<vmem>>, vector<1x128xf32>
    %13 = vector.broadcast %12 : vector<1x128xf32> to vector<8x128xf32>
    %14 = arith.addf %11, %13 : vector<8x128xf32>
    %cst_11 = arith.constant 0.000000e+00 : f32
    %15 = vector.broadcast %cst_11 : f32 to vector<8x128xf32>
    %16 = arith.maximumf %14, %15 : vector<8x128xf32>
    %17 = arith.truncf %16 : vector<8x128xf32> to vector<8x128xbf16>
    %c0_12 = arith.constant 0 : index
    %c0_13 = arith.constant 0 : index
    %18 = vector.load %arg6[%c0_12, %c0_13] : memref<128x128xbf16, #tpu.memory_space<vmem>>, vector<128x128xbf16>
    %cst_14 = arith.constant dense<0.000000e+00> : vector<8x128xf32>
    %19 = tpu.matmul %17, %18, %cst_14 {dimension_numbers = #tpu.dot_dimension_numbers<[1], [0], [0], [1], [0, 0, 1, 1], [], []>} : vector<8x128xbf16>, vector<128x128xbf16>, vector<8x128xf32> -> vector<8x128xf32>
    %c0_15 = arith.constant 0 : index
    %c0_16 = arith.constant 0 : index
    %20 = vector.load %arg7[%c0_15, %c0_16] : memref<1x128xf32, #tpu.memory_space<vmem>>, vector<1x128xf32>
    %21 = vector.broadcast %20 : vector<1x128xf32> to vector<8x128xf32>
    %22 = arith.addf %19, %21 : vector<8x128xf32>
    %c0_17 = arith.constant 0 : index
    %c0_18 = arith.constant 0 : index
    %23 = vector.load %arg8[%c0_17, %c0_18] : memref<8x128xf32, #tpu.memory_space<vmem>>, vector<8x128xf32>
    tpu.vector_store %arg8[%c0_17, %c0_18], %22 {strides = array<i32>} : memref<8x128xf32, #tpu.memory_space<vmem>>, vector<8x128xf32>,
    return
  }
  func.func @transform_0(%arg0: i32) -> (i32, i32) {
    %c0_i32 = arith.constant 0 : i32
    %c0_i32_0 = arith.constant 0 : i32
    return %arg0, %c0_i32 : i32, i32
  }
  func.func @transform_1(%arg0: i32) -> (i32, i32) {
    %c0_i32 = arith.constant 0 : i32
    %c0_i32_0 = arith.constant 0 : i32
    %c0_i32_1 = arith.constant 0 : i32
    return %c0_i32, %c0_i32_0 : i32, i32
  }
  func.func @transform_2(%arg0: i32) -> (i32, i32) {
    %c0_i32 = arith.constant 0 : i32
    %c0_i32_0 = arith.constant 0 : i32
    %c0_i32_1 = arith.constant 0 : i32
    return %c0_i32, %c0_i32_0 : i32, i32
  }
  func.func @transform_3(%arg0: i32) -> (i32, i32) {
    %c0_i32 = arith.constant 0 : i32
    %c0_i32_0 = arith.constant 0 : i32
    %c0_i32_1 = arith.constant 0 : i32
    return %c0_i32, %c0_i32_0 : i32, i32
  }
  func.func @transform_4(%arg0: i32) -> (i32, i32) {
    %c0_i32 = arith.constant 0 : i32
    %c0_i32_0 = arith.constant 0 : i32
    %c0_i32_1 = arith.constant 0 : i32
    return %c0_i32, %c0_i32_0 : i32, i32
  }
  func.func @transform_5(%arg0: i32) -> (i32, i32) {
    %c0_i32 = arith.constant 0 : i32
    %c0_i32_0 = arith.constant 0 : i32
    %c0_i32_1 = arith.constant 0 : i32
    return %c0_i32, %c0_i32_0 : i32, i32
  }
  func.func @transform_6(%arg0: i32) -> (i32, i32) {
    %c0_i32 = arith.constant 0 : i32
    %c0_i32_0 = arith.constant 0 : i32
    %c0_i32_1 = arith.constant 0 : i32
    return %c0_i32, %c0_i32_0 : i32, i32
  }
  func.func @transform_7(%arg0: i32) -> (i32, i32) {
    %c0_i32 = arith.constant 0 : i32
    %c0_i32_0 = arith.constant 0 : i32
    return %arg0, %c0_i32 : i32, i32
  }
}

</mosaic_0001>

<bundles_post_ra>
// kernel: _dueling_call.1
= control target key start
LH: loop header
LB: loop body
LE: loop exit
PB: predicated region body
PF: predicated region fallthrough
CT: control target
= control target key end

     0   :  { %12 = vsyncpa [#allocation3], 0  ;;  %s1135_s0 = inlined_call_operand.hbm [shape: f32[8,32], index: 0, kind: input, shape index: {}]   ;;  %s1136_s1 = inlined_call_operand.hbm [shape: bf16[32,512], index: 1, kind: input, shape index: {}]   ;;  %s1137_s2 = inlined_call_operand.hbm [shape: f32[1,512], index: 2, kind: input, shape index: {}]   ;;  %s1138_s3 = inlined_call_operand.hbm [shape: bf16[512,128], index: 3, kind: input, shape index: {}]   ;;  %s1139_s4 = inlined_call_operand.vmem [shape: f32[1,128], index: 4, kind: input, shape index: {}]   ;;  %s1140_s5 = inlined_call_operand.hbm [shape: bf16[128,128], index: 5, kind: input, shape index: {}]   ;;  %s1141_s6 = inlined_call_operand.vmem [shape: f32[1,128], index: 6, kind: input, shape index: {}]   ;;  %s1142_s7 = inlined_call_operand.hbm [shape: f32[8,128], index: 7, kind: output, shape index: {}]  }
   0x1   :  { %13 = vsyncpa [#allocation6], 0 }
   0x2   :  { %14 = vsyncpa [#allocation9], 0 }
   0x3   :  { %15 = vsyncpa [#allocation4], 0  ;;  %s1050_s24 = smov [#allocation5]  }
   0x4   :  { %s31_s25 = sshll.u32 %s1050_s24, 4  ;;  %s32_s25 = int_to_ptr.vmem [resolvable:$true] %s31_s25 }
   0x5   :  { %s930_s26 = scalar_lea.vmem %s32_s25, 1024  ;;  %p935_p1 = scmp.lt.s32.totalorder %s32_s25, %s32_s25 }
   0x6   :  { %p931_p0 = scmp.ne.s32.totalorder %s32_s25, %s930_s26  ;;  %p936_p2 = scmp.lt.s32.totalorder %s930_s26, %s930_s26 }
   0x8   :  { %p937_p3 = por %p936_p2, %p935_p1 }
   0xa   :  { %p938_p4 = pnand %p937_p3, %p931_p0 }
   0xc   :  { %941 = shalt.err (!%p938_p4)
}
   0xd   :  { %s1051_s27 = smov 256   ;;  %s1052_s28 = smov 16  }
   0xe   :  { %37 = dma.hbm_to_vmem [thread:$0]  %s1136_s1, 1024, %s32_s25, [#allocation6], %s1051_s27, %s1051_s27, %s1052_s28  }
   0xf   :  { %s1053_s8 = smov [#allocation8]  }
  0x10   :  { %s53_s9 = sshll.u32 %s1053_s8, 4  ;;  %s54_s9 = int_to_ptr.vmem [resolvable:$true] %s53_s9 }
  0x11   :  { %s950_s10 = scalar_lea.vmem %s54_s9, 4096  ;;  %p955_p6 = scmp.lt.s32.totalorder %s54_s9, %s54_s9 }
  0x12   :  { %p951_p5 = scmp.ne.s32.totalorder %s54_s9, %s950_s10  ;;  %p956_p7 = scmp.lt.s32.totalorder %s950_s10, %s950_s10 }
  0x14   :  { %p957_p8 = por %p956_p7, %p955_p6 }
  0x16   :  { %p958_p9 = pnand %p957_p8, %p951_p5 }
  0x18   :  { %961 = shalt.err (!%p958_p9)
}
  0x19   :  { %s1054_s11 = smov 64   ;;  %s1055_s12 = smov 4  }
  0x1a   :  { %59 = dma.hbm_to_vmem [thread:$0]  %s1138_s3, 4096, %s54_s9, [#allocation9], %s1054_s11, %s1054_s11, %s1055_s12  }
  0x1b   :  { %s1056_s1 = smov [#allocation2]   ;;  %s1057_s16 = smov [#allocation7]  }
  0x1c   :  { %s22_s15 = sshll.u32 %s1056_s1, 4  ;;  %s44_s17 = sshll.u32 %s1057_s16, 4  ;;  %s23_s15 = int_to_ptr.vmem [resolvable:$true] %s22_s15  ;;  %s45_s17 = int_to_ptr.vmem [resolvable:$true] %s44_s17 }
  0x1d   :  { %s970_s18 = scalar_lea.vmem %s23_s15, 128  ;;  %p975_p11 = scmp.lt.s32.totalorder %s23_s15, %s23_s15 }
  0x1e   :  { %p971_p10 = scmp.ne.s32.totalorder %s23_s15, %s970_s18  ;;  %p976_p12 = scmp.lt.s32.totalorder %s970_s18, %s970_s18 }
  0x20   :  { %p977_p13 = por %p976_p12, %p975_p11 }
  0x22   :  { %p978_p0 = pnand %p977_p13, %p971_p10 }
  0x24   :  { %981 = shalt.err (!%p978_p0)
}
  0x25   :  { %25 = dma.hbm_to_vmem [thread:$0]  %s1135_s0, 128, %s23_s15, [#allocation3]  }
  0x26   :  { %s990_s21 = scalar_lea.vmem %s45_s17, 64  ;;  %p995_p2 = scmp.lt.s32.totalorder %s45_s17, %s45_s17 }
  0x27   :  { %p991_p1 = scmp.ne.s32.totalorder %s45_s17, %s990_s21  ;;  %p996_p3 = scmp.lt.s32.totalorder %s990_s21, %s990_s21 }
  0x29   :  { %p997_p4 = por %p996_p3, %p995_p2 }
  0x2b   :  { %p998_p5 = pnand %p997_p4, %p991_p1 }
  0x2d   :  { %1001 = shalt.err (!%p998_p5)
}
  0x2e   :  { %47 = dma.hbm_to_vmem [thread:$0]  %s1137_s2, 64, %s45_s17, [#allocation6]  }
  0x2f   :  { %s1058_s23 = smov [#allocation10]  }
  0x30   :  { %s67_s24 = sshll.u32 %s1058_s23, 4  ;;  %s68_s24 = int_to_ptr.vmem [resolvable:$true] %s67_s24 }
  0x31   :  { %s1010_s25 = scalar_lea.vmem %s68_s24, 1024  ;;  %p1015_p7 = scmp.lt.s32.totalorder %s68_s24, %s68_s24 }
  0x32   :  { %p1011_p6 = scmp.ne.s32.totalorder %s68_s24, %s1010_s25  ;;  %p1016_p8 = scmp.lt.s32.totalorder %s1010_s25, %s1010_s25 }
  0x34   :  { %p1017_p9 = por %p1016_p8, %p1015_p7 }
  0x36   :  { %p1018_p10 = pnand %p1017_p9, %p1011_p6 }
  0x38   :  { %1021 = shalt.err (!%p1018_p10)
}
  0x39   :  { %73 = dma.hbm_to_vmem [thread:$0]  %s1140_s5, 1024, %s68_s24, [#allocation9], %s1054_s11, %s1054_s11, %s1055_s12  }
  0x3a   :  { %1042 = dma.done.wait [#allocation3], 128  }
  0x3b   :  { %1043 = vsyncadd [#allocation3], 4294967168 }
  0x3c   :  { %1044 = dma.done.wait [#allocation6], 1088  }
  0x3d   :  { %1045 = vsyncadd [#allocation6], 4294966208 }
  0x3e   :  { %1046 = dma.done.wait [#allocation9], 5120  }
  0x3f   :  { %1047 = vsyncadd [#allocation9], 4294962176  ;;  %v1059_v0 = vmov 0   ;;  %v870_v1 = vld [vmem:[#allocation5 + $0x24] ss:$16 sps:$4 sm:$0xff]   ;;  %v92_v5 = vld [vmem:[#allocation2] sm:$0xff]  ;;  %v104_v44 = vlaneseq }
  0x40   :  { %200 = vmatprep.mubr.bf16.mxu1 %v1059_v0  ;;  %v872_v2 = vld [vmem:[#allocation5 + $0x20] ss:$16 sps:$4 sm:$0xff]   ;;  %180 = vmatprep.subr.bf16.mxu1 %v870_v1  ;;  %v873_v3 = vld [vmem:[#allocation5 + $0x4] ss:$16 sps:$4 sm:$0xff]   ;;  %v878_v6 = vld [vmem:[#allocation5 + $0x2c] ss:$16 sps:$4 sm:$0xff]   ;;  %v93_v8 = vpack.c.bf16 %v92_v5, %v92_v5 }
  0x41   :  { %v875_v4 = vld [vmem:[#allocation5] ss:$16 sps:$4 sm:$0xff]   ;;  %181 = vmatpush1.bf16.msra.mxu1 %v872_v2  ;;  %v876_v7 = vld [vmem:[#allocation5 + $0x28] ss:$16 sps:$4 sm:$0xff]   ;;  %v881_v9 = vld [vmem:[#allocation5 + $0xc] ss:$16 sps:$4 sm:$0xff]  }
  0x42   :  { %182 = vmatprep.subr.bf16.mxu1 %v873_v3  ;;  %v882_v10 = vld [vmem:[#allocation8 + $0x78] sm:$0xff]   ;;  %vm164_vm0 = vcmask 261120   ;;  %v884_v12 = vld [vmem:[#allocation8 + $0x70] sm:$0xff]   ;;  %v886_v14 = vld [vmem:[#allocation8 + $0x68] sm:$0xff]   ;;  %v1060_v43 = vmov 0.0   ;;  %v105_v45 = vshrl.u32 %v104_v44, 7 }
  0x43   :  { %v883_v11 = vld [vmem:[#allocation8 + $0x38] sm:$0xff]   ;;  %784 = vmatprep.subr.bf16.mxu0 %v882_v10  ;;  %v885_v13 = vld [vmem:[#allocation8 + $0x30] sm:$0xff]   ;;  %v888_v17 = vld [vmem:[#allocation8 + $0x28] sm:$0xff]   ;;  %vm1061_vm1 = vmmov 0   ;;  %s1062_s29 = smov [#allocation11]  }
  0x44   :  { %785 = vmatpush3.bf16.msra.mxu0 %v883_v11  ;;  %v879_v15 = vld [vmem:[#allocation5 + $0x8] ss:$16 sps:$4 sm:$0xff]   ;;  %v887_v16 = vld [vmem:[#allocation8 + $0xf8] sm:$0xff]   ;;  %v895_v24 = vld [vmem:[#allocation8 + $0xe8] sm:$0xff]   ;;  %v106_v46 = vsub.s32 0, %v105_v45  ;;  %v110_v48 = vsub.s32 1, %v105_v45 }
  0x45   :  { %183 = vmatpush1.bf16.msra.mxu1 %v875_v4  ;;  %786 = vmatprep.subr.bf16.mxu0 %v884_v12  ;;  %v890_v18 = vld [vmem:[#allocation8 + $0x60] sm:$0xff]   ;;  %v889_v19 = vld [vmem:[#allocation8 + $0xb8] sm:$0xff]   ;;  %v891_v20 = vld [vmem:[#allocation8 + $0xf0] sm:$0xff]   ;;  %v114_v53 = vsub.s32 2, %v105_v45  ;;  %v118_v56 = vsub.s32 3, %v105_v45  ;;  %s721_s30 = sshll.u32 %s1062_s29, 4  ;;  %s722_s30 = int_to_ptr.vmem [resolvable:$true] %s721_s30 }
  0x46   :  { %221 = vmatprep.subr.bf16.mxu1 %v878_v6  ;;  %v892_v21 = vld [vmem:[#allocation8 + $0x20] sm:$0xff]   ;;  %v894_v22 = vld [vmem:[#allocation8 + $0x58] sm:$0xff]   ;;  %v893_v23 = vld [vmem:[#allocation8 + $0xb0] sm:$0xff]   ;;  %p1027_p12 = scmp.lt.s32.totalorder %s722_s30, %s722_s30 }
  0x47   :  { %v896_v25 = vld [vmem:[#allocation8 + $0x18] sm:$0xff]   ;;  %v898_v26 = vld [vmem:[#allocation8 + $0x50] sm:$0xff]   ;;  %v897_v27 = vld [vmem:[#allocation8 + $0xa8] sm:$0xff]  }
  0x48   :  { %740 = vmatmul.mubr.msk.bf16.vlgmr.msra.gmra.mxu1 %vm164_vm0, %v93_v8  ;;  %787 = vmatpush3.bf16.msra.mxu0 %v885_v13  ;;  %v899_v28 = vld [vmem:[#allocation8 + $0xe0] sm:$0xff]   ;;  %v900_v29 = vld [vmem:[#allocation8 + $0x10] sm:$0xff]   ;;  %v902_v31 = vld [vmem:[#allocation8 + $0x48] sm:$0xff]  }
  0x49   :  { %222 = vmatpush1.bf16.msra.mxu1 %v876_v7  ;;  %241 = vmatprep.mubr.bf16.mxu1 %v1059_v0  ;;  %v901_v30 = vld [vmem:[#allocation8 + $0xa0] sm:$0xff]   ;;  %v903_v32 = vld [vmem:[#allocation8 + $0xd8] sm:$0xff]   ;;  %v904_v33 = vld [vmem:[#allocation8 + $0x8] sm:$0xff]  }
  0x4a   :  { %223 = vmatprep.subr.bf16.mxu1 %v881_v9  ;;  %788 = vmatprep.subr.bf16.mxu0 %v886_v14  ;;  %v905_v34 = vld [vmem:[#allocation8 + $0x98] sm:$0xff]   ;;  %v906_v35 = vld [vmem:[#allocation8 + $0x40] sm:$0xff]   ;;  %v907_v36 = vld [vmem:[#allocation8 + $0xd0] sm:$0xff]  }
  0x4b   :  { %v908_v37 = vld [vmem:[#allocation8] sm:$0xff]   ;;  %v909_v38 = vld [vmem:[#allocation8 + $0x90] sm:$0xff]   ;;  %v910_v39 = vld [vmem:[#allocation8 + $0xc8] sm:$0xff]  }
  0x4c   :  { %789 = vmatpush3.bf16.msra.mxu0 %v888_v17  ;;  %v911_v40 = vld [vmem:[#allocation8 + $0x88] sm:$0xff]   ;;  %v912_v41 = vld [vmem:[#allocation8 + $0xc0] sm:$0xff]   ;;  %v102_v47 = vld [vmem:[#allocation7] sm:$0xf] }
  0x4d   :  { %224 = vmatpush1.bf16.msra.mxu1 %v879_v15  ;;  %790 = vmatprep.subr.bf16.mxu0 %v890_v18  ;;  %v913_v42 = vld [vmem:[#allocation8 + $0x80] sm:$0xff]   ;;  %v107_v49 = vrot.slane %v102_v47, %v106_v46  ;;  %v111_v50 = vrot.slane %v102_v47, %v110_v48  ;;  %v115_v59 = vrot.slane %v102_v47, %v114_v53  ;;  %v914_v0 = vld [vmem:[#allocation10 + $0x38] sm:$0xff]   ;;  %v915_v6 = vld [vmem:[#allocation10 + $0x30] sm:$0xff]  }
  0x4e   :  { %806 = vmatprep.subr.bf16.mxu1 %v887_v16  ;;  %v119_v63 = vrot.slane %v102_v47, %v118_v56  ;;  %v916_v12 = vld [vmem:[#allocation10 + $0x28] sm:$0xff]   ;;  %v917_v14 = vld [vmem:[#allocation10 + $0x20] sm:$0xff]   ;;  %v918_v15 = vld [vmem:[#allocation10 + $0x18] sm:$0xff]  }
  0x4f   :  { %v919_v16 = vld [vmem:[#allocation10 + $0x10] sm:$0xff]   ;;  %v920_v17 = vld [vmem:[#allocation10 + $0x8] sm:$0xff]   ;;  %v921_v18 = vld [vmem:[#allocation10] sm:$0xff]  }
  0x50   :  { %741 = vmatmul.mubr.msk.bf16.vlgmr.msra.gmra.mxu1 %vm164_vm0, %v93_v8  ;;  %791 = vmatpush3.bf16.msra.mxu0 %v892_v21 }
  0x51   :  { %807 = vmatpush3.bf16.msra.mxu1 %v889_v19  ;;  %792 = vmatprep.subr.bf16.mxu0 %v894_v22 }
  0x52   :  { %808 = vmatprep.subr.bf16.mxu1 %v891_v20 }
  0x54   :  { %793 = vmatpush3.bf16.msra.mxu0 %v896_v25 }
  0x55   :  { %809 = vmatpush3.bf16.msra.mxu1 %v893_v23  ;;  %794 = vmatprep.subr.bf16.mxu0 %v898_v26 }
  0x56   :  { %810 = vmatprep.subr.bf16.mxu1 %v895_v24  ;;  %v742_v24 = vld [vmem:[%s1139_s4] ss:$0 sm:$0xff]  ;;  %s1022_s4 = scalar_lea.vmem %s722_s30, 128 }
  0x57   :  { %p1023_p11 = scmp.ne.s32.totalorder %s722_s30, %s1022_s4  ;;  %p1028_p13 = scmp.lt.s32.totalorder %s1022_s4, %s1022_s4 }
  0x58   :  { %795 = vmatpush3.bf16.msra.mxu0 %v900_v29 }
  0x59   :  { %811 = vmatpush3.bf16.msra.mxu1 %v897_v27  ;;  %796 = vmatprep.subr.bf16.mxu0 %v902_v31  ;;  %p1029_p0 = por %p1028_p13, %p1027_p12 }
  0x5a   :  { %812 = vmatprep.subr.bf16.mxu1 %v899_v28 }
  0x5b   :  { %p1030_p1 = pnand %p1029_p0, %p1023_p11 }
  0x5c   :  { %797 = vmatpush3.bf16.msra.mxu0 %v904_v33 }
  0x5d   :  { %813 = vmatpush3.bf16.msra.mxu1 %v901_v30  ;;  %798 = vmatprep.subr.bf16.mxu0 %v906_v35 }
  0x5e   :  { %814 = vmatprep.subr.bf16.mxu1 %v903_v32 }
  0x60   :  { %799 = vmatpush3.bf16.msra.mxu0 %v908_v37 }
  0x61   :  { %815 = vmatpush3.bf16.msra.mxu1 %v905_v34  ;;  %837 = vmatprep.subr.bf16.mxu0 %v1060_v43  ;;  %v775_v34 = vld [vmem:[%s1141_s6] ss:$0 sm:$0xff] }
  0x62   :  { %816 = vmatprep.subr.bf16.mxu1 %v907_v36 }
  0x65   :  { %817 = vmatpush3.bf16.msra.mxu1 %v909_v38 }
  0x66   :  { %818 = vmatprep.subr.bf16.mxu1 %v910_v39 }
  0x69   :  { %819 = vmatpush3.bf16.msra.mxu1 %v911_v40 }
  0x6a   :  { %820 = vmatprep.subr.bf16.mxu1 %v912_v41 }
  0x6d   :  { %821 = vmatpush3.bf16.msra.mxu1 %v913_v42 }
 0x108   :  { %v202_v51 = vpop.f32.mrf.mxu1 }
 0x109   :  { %v203_v52 = vadd.f32 %v202_v51, %v107_v49 }
 0x10a   :  { %v204_v54 = vpop.f32.mrf.mxu1 }
 0x10b   :  { %v205_v55 = vadd.f32 %v204_v54, %v111_v50  ;;  %v250_v57 = vmax.f32 %v203_v52, 0.0 }
 0x10c   :  { %v206_v58 = vpop.f32.mrf.mxu1 }
 0x10d   :  { %v251_v60 = vmax.f32 %v205_v55, 0.0  ;;  %v254_v1 = vpack.c.bf16 %v250_v57, %v250_v57 }
 0x10e   :  { %v207_v61 = vpop.f32.mrf.mxu1 }
 0x10f   :  { %v255_v62 = vpack.c.bf16 %v251_v60, %v251_v60 }
 0x110   :  { %v243_v2 = vpop.f32.mrf.mxu1 }
 0x111   :  { %v244_v3 = vadd.f32 %v243_v2, %v115_v59  ;;  %553 = vmatprep.mubr.bf16.mxu0 %v255_v62 }
 0x112   :  { %v245_v4 = vpop.f32.mrf.mxu1  ;;  %554 = vmatmul.mubr.bf16.vlgmr.msra.gmra.mxu0 %v254_v1 }
 0x113   :  { %v246_v5 = vadd.f32 %v245_v4, %v119_v63  ;;  %838 = vmatpush3.bf16.msra.mxu0 %v914_v0  ;;  %v252_v7 = vmax.f32 %v244_v3, 0.0  ;;  %853 = vmatprep.mubr.msk.bf16.mxu0 %vm1061_vm1, %v1060_v43 }
 0x114   :  { %v247_v8 = vpop.f32.mrf.mxu1  ;;  %839 = vmatprep.subr.bf16.mxu0 %v1060_v43 }
 0x115   :  { %v253_v9 = vmax.f32 %v246_v5, 0.0  ;;  %v256_v13 = vpack.c.bf16 %v252_v7, %v252_v7 }
 0x116   :  { %v248_v10 = vpop.f32.mrf.mxu1 }
 0x117   :  { %v257_v11 = vpack.c.bf16 %v253_v9, %v253_v9  ;;  %840 = vmatpush3.bf16.msra.mxu0 %v915_v6 }
 0x118   :  { %841 = vmatprep.subr.bf16.mxu0 %v1060_v43 }
 0x119   :  { %593 = vmatprep.mubr.bf16.mxu1 %v257_v11 }
 0x11a   :  { %594 = vmatmul.mubr.bf16.vlgmr.msra.gmra.mxu1 %v256_v13 }
 0x11b   :  { %842 = vmatpush3.bf16.msra.mxu0 %v916_v12 }
 0x11c   :  { %843 = vmatprep.subr.bf16.mxu0 %v1060_v43 }
 0x11f   :  { %844 = vmatpush3.bf16.msra.mxu0 %v917_v14 }
 0x120   :  { %845 = vmatprep.subr.bf16.mxu0 %v1060_v43 }
 0x123   :  { %846 = vmatpush3.bf16.msra.mxu0 %v918_v15 }
 0x124   :  { %847 = vmatprep.subr.bf16.mxu0 %v1060_v43 }
 0x127   :  { %848 = vmatpush3.bf16.msra.mxu0 %v919_v16 }
 0x128   :  { %849 = vmatprep.subr.bf16.mxu0 %v1060_v43 }
 0x12b   :  { %850 = vmatpush3.bf16.msra.mxu0 %v920_v17 }
 0x12c   :  { %851 = vmatprep.subr.bf16.mxu0 %v1060_v43 }
 0x12f   :  { %852 = vmatpush3.bf16.msra.mxu0 %v921_v18 }
 0x1d2   :  { %v800_v19 = vpop.f32.mrf.mxu0 }
 0x1d4   :  { %v801_v20 = vpop.f32.mrf.mxu0 }
 0x1d5   :  { %v802_v23 = vadd.f32 %v801_v20, %v800_v19 }
 0x1d6   :  { %v803_v21 = vpop.f32.mrf.mxu0 }
 0x1d7   :  { %v556_v27 = vadd.f32 %v802_v23, %v742_v24 }
 0x1d8   :  { %v804_v22 = vpop.f32.mrf.mxu0 }
 0x1da   :  { %v822_v25 = vpop.f32.mrf.mxu1 }
 0x1dc   :  { %v823_v26 = vpop.f32.mrf.mxu1 }
 0x1dd   :  { %v824_v28 = vadd.f32 %v823_v26, %v822_v25 }
 0x1de   :  { %v825_v29 = vpop.f32.mrf.mxu1 }
 0x1df   :  { %v596_v30 = vadd.f32 %v824_v28, %v556_v27 }
 0x1e0   :  { %v826_v31 = vpop.f32.mrf.mxu1 }
 0x1e1   :  { %v601_v32 = vmax.f32 %v596_v30, 0.0 }
 0x1e3   :  { %v602_v33 = vpack.c.bf16 %v601_v32, %v601_v32 }
 0x1e5   :  { %854 = vmatmul.mubr.bf16.vlgmr.msra.gmra.mxu0 %v602_v33 }
 0x2a5   :  { %v708_v35 = vpop.f32.mrf.mxu0 }
 0x2a6   :  { %v709_v36 = vadd.f32 %v775_v34, %v708_v35 }
 0x2a7   :  { %v855_v37 = vpop.f32.mrf.mxu0 }
 0x2a8   :  { %714 = vst [vmem:[#allocation11] sm:$0xff] %v709_v36 }
 0x2a9   :  { %v711_v38 = vpop.f32.mrf.mxu0 }
 0x2aa   :  { %1033 = shalt.err (!%p1030_p1)
}
 0x2ab   :  { %724 = dma.vmem_to_hbm [thread:$0]  %s722_s30, 128, %s1142_s7, [#allocation4]   ;;  %v856_v39 = vpop.f32.mrf.mxu0 }
 0x2ac   :  { %1048 = dma.done.wait [#allocation4], 128  }
 0x2ad   :  { %1049 = vsyncadd [#allocation4], 4294967168 }
 0x2ae   :  { %728 = vsyncpa [#allocation3], 1 }
 0x2af   :  { %729 = vsyncpa [#allocation6], 1 }
 0x2b0   :  { %730 = vsyncpa [#allocation9], 1 }
 0x2b1   :  { %731 = vsyncpa [#allocation4], 1 }

</bundles_post_ra>
